<compile_context>
chip_gen: v5e
topology: v5e:2x2
jax: 0.10.0
libtpu: 0.0.40
codegen_flags: <defaults>
</compile_context>

<pallas_src>
import functools

import numpy as np
import jax
import jax.numpy as jnp
from jax.experimental import pallas as pl
from jax.experimental.pallas import tpu as pltpu

LANES = 128            # vreg lane width (last dim stays lane-dense)
CHUNK_ROWS = 8         # f32 sublanes per vreg -> one vreg per chunk per operand
N_SUMS = 8             # count, a1, a2, a3, sq, sq_log, abs_rel, sq_rel
MAX_TILE_GROUPS = 256  # 256 * 8 rows = 2048 rows -> 1 MiB f32 per operand tile

_TWO_CORE_CHIP_TAGS = ("v4", "v5p", "v7", "7x")


def _num_tensorcores_per_chip():
    """2 shards on megacore / 2-TC chips (v4, v5p, v7x); 1 on v5e/v6e."""
    try:
        kind = jax.devices()[0].device_kind.lower()
    except Exception:
        return 1
    return 2 if any(tag in kind for tag in _TWO_CORE_CHIP_TAGS) else 1


# ----------------------------------------------------------------------------
# Pallas kernel: masked per-lane metric sums over a (tile_rows, 128) block.
# ----------------------------------------------------------------------------
def _metrics_kernel(scale_ref, gt_ref, pred_ref, out_ref):
    # out_ref is this shard's (N_SUMS, LANES) accumulator, resident across the
    # inner ("arbitrary") grid axis; zero it on the shard's first inner step.
    @pl.when(pl.program_id(1) == 0)
    def _():
        out_ref[...] = jnp.zeros_like(out_ref)

    scale = scale_ref[0]
    tile_rows = gt_ref.shape[0]            # static
    n_chunks = tile_rows // CHUNK_ROWS     # static

    zeros = jnp.zeros((CHUNK_ROWS, LANES), jnp.float32)
    init = (zeros,) * N_SUMS

    def body(c, acc):
        cnt_a, a1_a, a2_a, a3_a, sq_a, sql_a, ar_a, sr_a = acc
        r = pl.multiple_of(c * CHUNK_ROWS, CHUNK_ROWS)
        gt = gt_ref[pl.ds(r, CHUNK_ROWS), :]                       # (8, 128)
        pred = jnp.clip(pred_ref[pl.ds(r, CHUNK_ROWS), :] * scale,
                        0.001, 80.0)                               # torch.clamp

        mask = gt != 0.0                      # validity (invalid pixels: gt==0)
        maskf = mask.astype(jnp.float32)

        # EUP (free slot) reciprocals; VALU is the binding resource.
        inv_pred = pl.reciprocal(pred, approx=True)   # pred in [1e-3, 80]
        inv_gt = pl.reciprocal(gt, approx=True)       # inf/huge on invalid px
        ratio = gt * inv_pred                         # 0 on invalid px
        # thresh MUST use the unmasked inv_gt: +inf on invalid -> compares false.
        thresh = jnp.maximum(ratio, pred * inv_gt)

        a1 = (thresh < 1.25).astype(jnp.float32)
        a2 = (thresh < 1.25 ** 2).astype(jnp.float32)
        a3 = (thresh < 1.25 ** 3).astype(jnp.float32)

        # Mask once at the source (3 selects total per element).
        diff = jnp.where(mask, gt - pred, 0.0)
        sq = diff * diff
        log_r = jnp.where(mask, jnp.log(ratio), 0.0)
        inv_gt_m = jnp.where(mask, inv_gt, 0.0)
        abs_rel = jnp.abs(diff) * inv_gt_m
        sq_rel = sq * inv_gt_m

        return (cnt_a + maskf, a1_a + a1, a2_a + a2, a3_a + a3,
                sq_a + sq, sql_a + log_r * log_r, ar_a + abs_rel, sr_a + sq_rel)

    acc = jax.lax.fori_loop(0, n_chunks, body, init)

    # One sublane reduction per metric per tile (amortized over the whole tile).
    partials = jnp.concatenate(
        [jnp.sum(a, axis=0, keepdims=True) for a in acc], axis=0)  # (8, 128)
    out_ref[...] += partials


# ----------------------------------------------------------------------------
# Host-side glue.
# ----------------------------------------------------------------------------
def _metric_sums_dense(gt, pred, scale):
    """Plain-jnp masked metric sums for the small unaligned tail."""
    pred = jnp.clip(pred * scale, 0.001, 80.0)
    mask = gt != 0.0
    maskf = mask.astype(jnp.float32)
    gt_safe = jnp.where(mask, gt, 1.0)
    thresh = jnp.maximum(gt_safe / pred, pred / gt_safe)
    a1 = maskf * (thresh < 1.25)
    a2 = maskf * (thresh < 1.25 ** 2)
    a3 = maskf * (thresh < 1.25 ** 3)
    diff = jnp.where(mask, gt - pred, 0.0)
    sq = diff * diff
    log_r = jnp.where(mask, jnp.log(gt_safe / pred), 0.0)
    abs_rel = jnp.abs(diff) / gt_safe
    sq_rel = sq / gt_safe
    return jnp.stack([jnp.sum(maskf), jnp.sum(a1), jnp.sum(a2), jnp.sum(a3),
                      jnp.sum(sq), jnp.sum(log_r * log_r),
                      jnp.sum(abs_rel), jnp.sum(sq_rel)])


def _masked_metric_sums(depth_gt, depth_pred, scaling, num_shards):
    gt = depth_gt.reshape(-1)
    pred = depth_pred.reshape(-1)
    n = gt.shape[0]
    scaling = jnp.asarray(scaling, jnp.float32)

    rows_total = n // LANES
    groups_total = rows_total // CHUNK_ROWS        # 8-row groups available
    sums = jnp.zeros((N_SUMS,), jnp.float32)
    main_elems = 0

    if groups_total >= 1:
        # Exact (no-padding) tiling: main_rows = shards * inner_steps * tile_rows.
        shards = min(num_shards, groups_total)
        per_shard_groups = groups_total // shards
        inner_steps = -(-per_shard_groups // MAX_TILE_GROUPS)
        tile_rows = (per_shard_groups // inner_steps) * CHUNK_ROWS
        main_rows = shards * inner_steps * tile_rows
        main_elems = main_rows * LANES

        gt_main = gt[:main_elems].reshape(main_rows, LANES)     # prefix, no pad
        pred_main = pred[:main_elems].reshape(main_rows, LANES)
        scale_smem = scaling.reshape(1)

        idx = lambda s, i: (s * inner_steps + i, 0)
        out = pl.pallas_call(
            _metrics_kernel,
            out_shape=jax.ShapeDtypeStruct((shards * N_SUMS, LANES), jnp.float32),
            grid_spec=pltpu.PrefetchScalarGridSpec(
                num_scalar_prefetch=0,
                grid=(shards, inner_steps),
                in_specs=[
                    pl.BlockSpec(memory_space=pltpu.MemorySpace.SMEM),  # scale
                    pl.BlockSpec((tile_rows, LANES), idx),              # gt
                    pl.BlockSpec((tile_rows, LANES), idx),              # pred
                ],
                out_specs=pl.BlockSpec((N_SUMS, LANES), lambda s, i: (s, 0)),
            ),
            compiler_params=pltpu.CompilerParams(
                dimension_semantics=("parallel", "arbitrary")),
        )(scale_smem, gt_main, pred_main)

        # Combine shard blocks and per-lane partials.
        sums = sums + out.reshape(shards, N_SUMS, LANES).sum(axis=(0, 2))

    if main_elems < n:
        # TODO(synk): ragged tail (< one tile) reduced in plain JAX glue.
        sums = sums + _metric_sums_dense(gt[main_elems:], pred[main_elems:],
                                         scaling)
    return sums


# ----------------------------------------------------------------------------
# Exact masked median (torch.median semantics) without sorting.
# ----------------------------------------------------------------------------
def _float_as_ordered_u32(x):
    """Order-preserving bijection f32 -> u32 (monotone for all non-NaN floats)."""
    b = jax.lax.bitcast_convert_type(x, jnp.uint32)
    return jnp.where(b >= jnp.uint32(0x80000000),
                     ~b,                               # negative floats
                     b | jnp.uint32(0x80000000))       # non-negative floats


def _ordered_u32_as_float(key):
    b = jnp.where(key >= jnp.uint32(0x80000000),
                  key ^ jnp.uint32(0x80000000),
                  ~key)
    return jax.lax.bitcast_convert_type(b, jnp.float32)


def _masked_kth_smallest(x, valid, k):
    """Exact (k+1)-th smallest element of x[valid] via 32 bitwise-bisection
    counting passes (streaming reductions; far cheaper than jnp.sort on TPU).
    TODO(synk): counting passes stay in plain JAX glue (not a Pallas kernel)."""
    key = _float_as_ordered_u32(x.reshape(-1).astype(jnp.float32))
    valid = valid.reshape(-1)
    target = jnp.asarray(k, jnp.int32) + 1
    res = jnp.uint32(0)
    for b in range(31, -1, -1):                        # unrolled at trace time
        t = res | jnp.uint32((1 << b) - 1)
        cnt = jnp.sum((valid & (key <= t)).astype(jnp.int32))
        res = jnp.where(cnt >= target, res, res | jnp.uint32(1 << b))
    return _ordered_u32_as_float(res)


def _masked_median(x, valid):
    """torch.median semantics: lower of the two middle values for even counts."""
    cnt = jnp.sum(valid.reshape(-1).astype(jnp.int32))
    k = jnp.maximum((cnt - 1) // 2, 0)
    return _masked_kth_smallest(x, valid, k)


# ----------------------------------------------------------------------------
# Metric computation (jitted end-to-end).
# ----------------------------------------------------------------------------
@functools.partial(jax.jit, static_argnames=("depth_scaling", "num_shards"))
def _compute_depth_metrics(depth_gt, depth_pred, *, depth_scaling, num_shards):
    gt = depth_gt.astype(jnp.float32)
    pred = depth_pred.astype(jnp.float32)
    if depth_scaling == "median":
        mask = gt > 0
        scaling = _masked_median(gt, mask) / _masked_median(pred, mask)
    else:
        scaling = jnp.float32(1.0)

    sums = _masked_metric_sums(gt, pred, scaling, num_shards)
    count = sums[0]
    inv = 1.0 / count
    return {
        "abs_rel": sums[6] * inv,
        "sq_rel": sums[7] * inv,
        "rmse": jnp.sqrt(sums[4] * inv),
        "rmse_log": jnp.sqrt(sums[5] * inv),
        "a1": sums[1] * inv,
        "a2": sums[2] * inv,
        "a3": sums[3] * inv,
    }


class BTSWrapper:
    """JAX/Pallas port of models/vipocc/evaluator_pseudo_depth.BTSWrapper."""

    def __init__(self, config):
        self.depth_scaling = config["depth_scaling"]
        self._num_shards = _num_tensorcores_per_chip()

    @staticmethod
    def get_loss_metric_names():
        return ["loss", "loss_l2", "loss_mask", "loss_temporal"]

    def __call__(self, data):
        return self.forward(data)

    def forward(self, data):
        data = dict(data)
        data.update(self.compute_depth_metrics(data))
        return data

    def compute_depth_metrics(self, data):
        depth_gt = data["depths"][0]
        depth_pred = data["pseudo_depth"][0]
        return _compute_depth_metrics(depth_gt, depth_pred,
                                      depth_scaling=self.depth_scaling,
                                      num_shards=self._num_shards)


# ----------------------------------------------------------------------------
# Self-test helpers (pure JAX, eager).
# ----------------------------------------------------------------------------
def _masked_median_sort(x, mask):
    flat = x.reshape(-1)
    m = mask.reshape(-1)
    s = jnp.sort(jnp.where(m, flat, jnp.inf))
    n_valid = jnp.sum(m.astype(jnp.int32))
    return s[jnp.maximum((n_valid - 1) // 2, 0)]


def _reference_metrics(depth_gt, depth_pred, scaling):
    """Pure-JAX (eager, boolean-indexing) reference of the PyTorch math."""
    pred = jnp.clip(scaling * depth_pred, 0.001, 80.0)
    mask = depth_gt != 0
    gt = depth_gt[mask]
    pred = pred[mask]
    thresh = jnp.maximum(gt / pred, pred / gt)
    return {
        "a1": (thresh < 1.25).astype(jnp.float32).mean(),
        "a2": (thresh < 1.25 ** 2).astype(jnp.float32).mean(),
        "a3": (thresh < 1.25 ** 3).astype(jnp.float32).mean(),
        "rmse": jnp.sqrt(((gt - pred) ** 2).mean()),
        "rmse_log": jnp.sqrt(((jnp.log(gt) - jnp.log(pred)) ** 2).mean()),
        "abs_rel": (jnp.abs(gt - pred) / gt).mean(),
        "sq_rel": ((gt - pred) ** 2 / gt).mean(),
    }


if __name__ == "__main__":
    key = jax.random.PRNGKey(0)
    k1, k2, k3 = jax.random.split(key, 3)

    # Small NCHW depth maps; size chosen so both the Pallas main path and the
    # ragged-tail glue path are exercised (2*1*48*60 = 5760 = 45 rows of 128).
    B, C, H, W = 2, 1, 48, 60
    depth_gt = jax.random.uniform(k1, (B, C, H, W), jnp.float32, 1.0, 60.0)
    invalid = jax.random.uniform(k3, (B, C, H, W)) < 0.2
    depth_gt = jnp.where(invalid, 0.0, depth_gt)       # zeros = invalid pixels
    depth_pred = jax.random.uniform(k2, (B, C, H, W), jnp.float32, 0.5, 70.0)

    data = {
        "depths": [depth_gt, depth_gt],
        "pseudo_depth": [depth_pred, depth_pred],
    }

    model = BTSWrapper({"depth_scaling": "median"})
    out = model(data)

    metric_names = ["abs_rel", "sq_rel", "rmse", "rmse_log", "a1", "a2", "a3"]
    metrics = {k: out[k] for k in metric_names}
    jax.block_until_ready(metrics)

    # --- sanity checks ------------------------------------------------------
    mask_pos = depth_gt > 0
    med_gt_ref = _masked_median_sort(depth_gt, mask_pos)
    med_pr_ref = _masked_median_sort(depth_pred, mask_pos)
    # bisection-selection median must match the sort-based one exactly
    np.testing.assert_allclose(np.asarray(_masked_median(depth_gt, mask_pos)),
                               np.asarray(med_gt_ref), rtol=1e-6)
    np.testing.assert_allclose(np.asarray(_masked_median(depth_pred, mask_pos)),
                               np.asarray(med_pr_ref), rtol=1e-6)

    scaling = med_gt_ref / med_pr_ref
    ref = _reference_metrics(depth_gt, depth_pred, scaling)
    # tolerance loosened for the EUP approx reciprocals used in the kernel
    for k in metric_names:
        np.testing.assert_allclose(np.asarray(metrics[k]), np.asarray(ref[k]),
                                   rtol=5e-3, atol=2e-3)

    print("KERNEL_OK")
</pallas_src>

<mosaic_0001>
module attributes {stable_mosaic.version = 11 : i64} {
  func.func @_metrics_kernel(%arg0: i32, %arg1: i32, %arg2: memref<1xf32, #tpu.memory_space<smem>>, %arg3: memref<40x128xf32, #tpu.memory_space<vmem>>, %arg4: memref<40x128xf32, #tpu.memory_space<vmem>>, %arg5: memref<8x128xf32, #tpu.memory_space<vmem>>) attributes {dimension_semantics = [#tpu.dimension_semantics<parallel>, #tpu.dimension_semantics<arbitrary>], iteration_bounds = array<i64: 1, 1>, scalar_prefetch = 0 : i64, scratch_operands = 0 : i64, tpu.core_type = #tpu.core_type<tc>, window_params = [{transform_indices = @transform_0, window_bounds = array<i64: 1>}, {transform_indices = @transform_1, window_bounds = array<i64: 40, 128>}, {transform_indices = @transform_2, window_bounds = array<i64: 40, 128>}, {transform_indices = @transform_3, window_bounds = array<i64: 8, 128>}]} {
    %c0_i32 = arith.constant 0 : i32
    %0 = arith.cmpi eq, %arg1, %c0_i32 : i32
    %1 = arith.extui %0 : i1 to i32
    %c0_i32_0 = arith.constant 0 : i32
    %2 = arith.cmpi ne, %1, %c0_i32_0 : i32
    scf.if %2 {
      %cst_15 = arith.constant 0.000000e+00 : f32
      %27 = vector.broadcast %cst_15 : f32 to vector<8x128xf32>
      %c0_16 = arith.constant 0 : index
      %c0_17 = arith.constant 0 : index
      %28 = vector.load %arg5[%c0_16, %c0_17] : memref<8x128xf32, #tpu.memory_space<vmem>>, vector<8x128xf32>
      tpu.vector_store %arg5[%c0_16, %c0_17], %27 {strides = array<i32>} : memref<8x128xf32, #tpu.memory_space<vmem>>, vector<8x128xf32>,
    } else {
    }
    %c0 = arith.constant 0 : index
    %3 = memref.load %arg2[%c0] : memref<1xf32, #tpu.memory_space<smem>>
    %cst = arith.constant 0.000000e+00 : f32
    %4 = vector.broadcast %cst : f32 to vector<8x128xf32>
    %c0_i32_1 = arith.constant 0 : i32
    %c5_i32 = arith.constant 5 : i32
    %5 = arith.addi %c0_i32_1, %c5_i32 : i32
    %c1_i32 = arith.constant 1 : i32
    %6:8 = scf.for %arg6 = %c0_i32_1 to %5 step %c1_i32 iter_args(%arg7 = %4, %arg8 = %4, %arg9 = %4, %arg10 = %4, %arg11 = %4, %arg12 = %4, %arg13 = %4, %arg14 = %4) -> (vector<8x128xf32>, vector<8x128xf32>, vector<8x128xf32>, vector<8x128xf32>, vector<8x128xf32>, vector<8x128xf32>, vector<8x128xf32>, vector<8x128xf32>)  : i32 {
      %c8_i32 = arith.constant 8 : i32
      %27 = arith.muli %arg6, %c8_i32 : i32
      %28 = tpu.assume_multiple %27, 8 : i32
      %29 = arith.index_cast %28 : i32 to index
      %c0_15 = arith.constant 0 : index
      %30 = vector.load %arg3[%29, %c0_15] : memref<40x128xf32, #tpu.memory_space<vmem>>, vector<8x128xf32>
      %31 = arith.index_cast %28 : i32 to index
      %c0_16 = arith.constant 0 : index
      %32 = vector.load %arg4[%31, %c0_16] : memref<40x128xf32, #tpu.memory_space<vmem>>, vector<8x128xf32>
      %33 = vector.broadcast %3 : f32 to vector<8x128xf32>
      %34 = arith.mulf %32, %33 : vector<8x128xf32>
      %cst_17 = arith.constant 1.000000e-03 : f32
      %cst_18 = arith.constant 8.000000e+01 : f32
      %35 = vector.broadcast %cst_17 : f32 to vector<8x128xf32>
      %36 = arith.maximumf %35, %34 : vector<8x128xf32>
      %37 = vector.broadcast %cst_18 : f32 to vector<8x128xf32>
      %38 = arith.minimumf %37, %36 : vector<8x128xf32>
      %cst_19 = arith.constant 0.000000e+00 : f32
      %39 = vector.broadcast %cst_19 : f32 to vector<8x128xf32>
      %40 = arith.cmpf one, %30, %39 : vector<8x128xf32>
      %41 = arith.extui %40 : vector<8x128xi1> to vector<8x128xi32>
      %42 = arith.sitofp %41 : vector<8x128xi32> to vector<8x128xf32>
      %43 = tpu.reciprocal %38 {approx = true} : vector<8x128xf32> -> vector<8x128xf32>
      %44 = tpu.reciprocal %30 {approx = true} : vector<8x128xf32> -> vector<8x128xf32>
      %45 = arith.mulf %30, %43 : vector<8x128xf32>
      %46 = arith.mulf %38, %44 : vector<8x128xf32>
      %47 = arith.maximumf %45, %46 : vector<8x128xf32>
      %cst_20 = arith.constant 1.250000e+00 : f32
      %48 = vector.broadcast %cst_20 : f32 to vector<8x128xf32>
      %49 = arith.cmpf olt, %47, %48 : vector<8x128xf32>
      %50 = arith.extui %49 : vector<8x128xi1> to vector<8x128xi32>
      %51 = arith.sitofp %50 : vector<8x128xi32> to vector<8x128xf32>
      %cst_21 = arith.constant 1.562500e+00 : f32
      %52 = vector.broadcast %cst_21 : f32 to vector<8x128xf32>
      %53 = arith.cmpf olt, %47, %52 : vector<8x128xf32>
      %54 = arith.extui %53 : vector<8x128xi1> to vector<8x128xi32>
      %55 = arith.sitofp %54 : vector<8x128xi32> to vector<8x128xf32>
      %cst_22 = arith.constant 1.953125 : f32
      %56 = vector.broadcast %cst_22 : f32 to vector<8x128xf32>
      %57 = arith.cmpf olt, %47, %56 : vector<8x128xf32>
      %58 = arith.extui %57 : vector<8x128xi1> to vector<8x128xi32>
      %59 = arith.sitofp %58 : vector<8x128xi32> to vector<8x128xf32>
      %60 = arith.subf %30, %38 : vector<8x128xf32>
      %cst_23 = arith.constant 0.000000e+00 : f32
      %61 = vector.broadcast %cst_23 : f32 to vector<8x128xf32>
      %62 = arith.select %40, %60, %61 : vector<8x128xi1>, vector<8x128xf32>
      %63 = arith.mulf %62, %62 : vector<8x128xf32>
      %64 = math.log %45 : vector<8x128xf32>
      %cst_24 = arith.constant 0.000000e+00 : f32
      %65 = vector.broadcast %cst_24 : f32 to vector<8x128xf32>
      %66 = arith.select %40, %64, %65 : vector<8x128xi1>, vector<8x128xf32>
      %cst_25 = arith.constant 0.000000e+00 : f32
      %67 = vector.broadcast %cst_25 : f32 to vector<8x128xf32>
      %68 = arith.select %40, %44, %67 : vector<8x128xi1>, vector<8x128xf32>
      %69 = math.absf %62 : vector<8x128xf32>
      %70 = arith.mulf %69, %68 : vector<8x128xf32>
      %71 = arith.mulf %63, %68 : vector<8x128xf32>
      %72 = arith.addf %arg7, %42 : vector<8x128xf32>
      %73 = arith.addf %arg8, %51 : vector<8x128xf32>
      %74 = arith.addf %arg9, %55 : vector<8x128xf32>
      %75 = arith.addf %arg10, %59 : vector<8x128xf32>
      %76 = arith.addf %arg11, %63 : vector<8x128xf32>
      %77 = arith.mulf %66, %66 : vector<8x128xf32>
      %78 = arith.addf %arg12, %77 : vector<8x128xf32>
      %79 = arith.addf %arg13, %70 : vector<8x128xf32>
      %80 = arith.addf %arg14, %71 : vector<8x128xf32>
      scf.yield %72, %73, %74, %75, %76, %78, %79, %80 : vector<8x128xf32>, vector<8x128xf32>, vector<8x128xf32>, vector<8x128xf32>, vector<8x128xf32>, vector<8x128xf32>, vector<8x128xf32>, vector<8x128xf32>
    }
    %c5_i32_2 = arith.constant 5 : i32
    %cst_3 = arith.constant dense<0.000000e+00> : vector<128xf32>
    %7 = vector.multi_reduction <add>, %6#0, %cst_3 [0] : vector<8x128xf32> to vector<128xf32>
    %8 = vector.shape_cast %7 : vector<128xf32> to vector<1x128xf32>
    %cst_4 = arith.constant dense<0.000000e+00> : vector<128xf32>
    %9 = vector.multi_reduction <add>, %6#1, %cst_4 [0] : vector<8x128xf32> to vector<128xf32>
    %10 = vector.shape_cast %9 : vector<128xf32> to vector<1x128xf32>
    %cst_5 = arith.constant dense<0.000000e+00> : vector<128xf32>
    %11 = vector.multi_reduction <add>, %6#2, %cst_5 [0] : vector<8x128xf32> to vector<128xf32>
    %12 = vector.shape_cast %11 : vector<128xf32> to vector<1x128xf32>
    %cst_6 = arith.constant dense<0.000000e+00> : vector<128xf32>
    %13 = vector.multi_reduction <add>, %6#3, %cst_6 [0] : vector<8x128xf32> to vector<128xf32>
    %14 = vector.shape_cast %13 : vector<128xf32> to vector<1x128xf32>
    %cst_7 = arith.constant dense<0.000000e+00> : vector<128xf32>
    %15 = vector.multi_reduction <add>, %6#4, %cst_7 [0] : vector<8x128xf32> to vector<128xf32>
    %16 = vector.shape_cast %15 : vector<128xf32> to vector<1x128xf32>
    %cst_8 = arith.constant dense<0.000000e+00> : vector<128xf32>
    %17 = vector.multi_reduction <add>, %6#5, %cst_8 [0] : vector<8x128xf32> to vector<128xf32>
    %18 = vector.shape_cast %17 : vector<128xf32> to vector<1x128xf32>
    %cst_9 = arith.constant dense<0.000000e+00> : vector<128xf32>
    %19 = vector.multi_reduction <add>, %6#6, %cst_9 [0] : vector<8x128xf32> to vector<128xf32>
    %20 = vector.shape_cast %19 : vector<128xf32> to vector<1x128xf32>
    %cst_10 = arith.constant dense<0.000000e+00> : vector<128xf32>
    %21 = vector.multi_reduction <add>, %6#7, %cst_10 [0] : vector<8x128xf32> to vector<128xf32>
    %22 = vector.shape_cast %21 : vector<128xf32> to vector<1x128xf32>
    %23 = tpu.concatenate %8, %10, %12, %14, %16, %18, %20, %22 in 0 : vector<1x128xf32>, vector<1x128xf32>, vector<1x128xf32>, vector<1x128xf32>, vector<1x128xf32>, vector<1x128xf32>, vector<1x128xf32>, vector<1x128xf32> -> vector<8x128xf32>
    %c0_11 = arith.constant 0 : index
    %c0_12 = arith.constant 0 : index
    %24 = vector.load %arg5[%c0_11, %c0_12] : memref<8x128xf32, #tpu.memory_space<vmem>>, vector<8x128xf32>
    %25 = arith.addf %24, %23 : vector<8x128xf32>
    %c0_13 = arith.constant 0 : index
    %c0_14 = arith.constant 0 : index
    %26 = vector.load %arg5[%c0_13, %c0_14] : memref<8x128xf32, #tpu.memory_space<vmem>>, vector<8x128xf32>
    tpu.vector_store %arg5[%c0_13, %c0_14], %25 {strides = array<i32>} : memref<8x128xf32, #tpu.memory_space<vmem>>, vector<8x128xf32>,
    return
  }
  func.func @transform_0(%arg0: i32, %arg1: i32) -> i32 {
    %c0_i32 = arith.constant 0 : i32
    %c0_i32_0 = arith.constant 0 : i32
    return %c0_i32 : i32
  }
  func.func @transform_1(%arg0: i32, %arg1: i32) -> (i32, i32) {
    %c1_i32 = arith.constant 1 : i32
    %0 = arith.muli %arg0, %c1_i32 : i32
    %1 = arith.addi %0, %arg1 : i32
    %c0_i32 = arith.constant 0 : i32
    %c0_i32_0 = arith.constant 0 : i32
    return %1, %c0_i32 : i32, i32
  }
  func.func @transform_2(%arg0: i32, %arg1: i32) -> (i32, i32) {
    %c1_i32 = arith.constant 1 : i32
    %0 = arith.muli %arg0, %c1_i32 : i32
    %1 = arith.addi %0, %arg1 : i32
    %c0_i32 = arith.constant 0 : i32
    %c0_i32_0 = arith.constant 0 : i32
    return %1, %c0_i32 : i32, i32
  }
  func.func @transform_3(%arg0: i32, %arg1: i32) -> (i32, i32) {
    %c0_i32 = arith.constant 0 : i32
    %c0_i32_0 = arith.constant 0 : i32
    return %arg0, %c0_i32 : i32, i32
  }
}

</mosaic_0001>

<bundles_post_ra>
// kernel: _compute_depth_metrics.1
= control target key start
LH: loop header
LB: loop body
LE: loop exit
PB: predicated region body
PF: predicated region fallthrough
CT: control target
= control target key end

     0   :  { %v395_v0 = vmov 0.0   ;;  %v420_v1 = vmov 0.0   ;;  %v422_v2 = vmov 0.0   ;;  %v424_v3 = vmov 0.0   ;;  %s436_s14 = smov 0   ;;  %s488_s0 = inlined_call_operand.<no memory space> [shape: f32[1], index: 0, kind: input, shape index: {}]   ;;  %s489_s1 = inlined_call_operand.vmem [shape: f32[40,128], index: 1, kind: input, shape index: {}]   ;;  %s490_s2 = inlined_call_operand.vmem [shape: f32[40,128], index: 2, kind: input, shape index: {}]   ;;  %s491_s3 = inlined_call_operand.vmem [shape: f32[8,128], index: 3, kind: output, shape index: {}]  }
   0x1   :  { %63 = vst [vmem:[%s491_s3] sm:$0xff] %v395_v0  ;;  %v426_v4 = vmov 0.0   ;;  %v428_v5 = vmov 0.0   ;;  %v430_v6 = vmov 0.0   ;;  %v432_v7 = vmov 0.0  }
   0x2   :  { %v434_v8 = vmov 0.0  }
   0x3 LB: > { %s238_s15 = sshll.u32 %s393_s14, 3  ;;  %v84_v11 = vstv %s488_s0  ;;  %v396_v13 = vmov 0.0   ;;  %s70_s14 = sadd.s32 1, %s393_s14   ;;  %s393_s14 = sphi %s436_s14, %s70_s14   ;;  %v389_v8 = vphi %v434_v8, %v499_v8   ;;  %v385_v7 = vphi %v432_v7, %v498_v7   ;;  %v381_v6 = vphi %v430_v6, %v497_v6   ;;  %v377_v5 = vphi %v428_v5, %v496_v5   ;;  %v373_v4 = vphi %v426_v4, %v495_v4   ;;  %v369_v3 = vphi %v424_v3, %v494_v3   ;;  %v365_v2 = vphi %v422_v2, %v493_v2   ;;  %v361_v1 = vphi %v420_v1, %v492_v1  }
   0x4   : > { %s80_s18 = scalar_lea.vmem %s489_s1, %s238_s15  ;;  %s82_s21 = scalar_lea.vmem %s490_s2, %s238_s15 }
   0x5   : > { %v81_v9 = vld [vmem:[%s80_s18] sm:$0xff]  ;;  %p67_p0 = scmp.ge.s32.totalorder %s70_s14, 5  }
   0x6   : > { %v83_v10 = vld [vmem:[%s82_s21] sm:$0xff]  ;;  %vm88_vm0 = vcmp.ne.f32.partialorder %v81_v9, 0.0  ;;  %317 = vrcp.f32 %v81_v9  ;;  %vm172_vm4 = vcmask (%p67_p0), 1040384   ;;  %vm174_vm5 = vcmask (%p67_p0), 1041408  }
   0x7   : > { %v85_v12 = vmul.f32 %v84_v11, %v83_v10  ;;  %v239_v14 = vsel %vm88_vm0, 1.0, %v396_v13  ;;  %vm176_vm6 = vcmask (%p67_p0), 1042432   ;;  %vm178_vm7 = vcmask (%p67_p0), 1043456  }
   0x8   : > { %v115_v16 = vadd.f32 %v389_v8, %v239_v14   ;;  %vm180_vm8 = vcmask (%p67_p0), 1044480   ;;  %vm182_vm9 = vcmask (%p67_p0), 1045504   ;;  %vm184_vm10 = vcmask (%p67_p0), 1046528  }
   0x9   : > { %v86_v15 = vmax.f32 %v85_v12, 0.001 }
   0xa   : > { %v499_v8 = vmov %v115_v16  ;;  %v124_v44 = vrot.slane (%p67_p0), %v115_v16, 4 }
   0xb   : > { %v87_v17 = vmin.f32 %v86_v15, 80.0 }
   0xc   : > { %v318_v19 = vpop.eup %317  ;;  %v125_v52 = vadd.f32 (%p67_p0), %v124_v44, %v115_v16 }
   0xd   : > { %319 = vrcp.f32 %v87_v17  ;;  %v105_v18 = vsub.f32 %v81_v9, %v87_v17  ;;  %v111_v21 = vsel %vm88_vm0, %v318_v19, 0.0  ;;  %v94_v24 = vmul.f32 %v318_v19, %v87_v17 }
   0xe   :  { %v126_v60 = vrot.slane (%p67_p0), %v125_v52, 2 }
   0xf   : > { %v106_v20 = vsel %vm88_vm0, %v105_v18, 0.0 }
  0x10   : > { %v107_v22 = vmul.f32 %v106_v20, %v106_v20  ;;  %v112_v23 = vand.u32 2147483647, %v106_v20 }
  0x12   : > { %v113_v25 = vmul.f32 %v112_v23, %v111_v21  ;;  %v114_v26 = vmul.f32 %v111_v21, %v107_v22  ;;  %v119_v27 = vadd.f32 %v373_v4, %v107_v22  }
  0x13   : > { %v320_v28 = vpop.eup %319 }
  0x14   : > { %v93_v29 = vmul.f32 %v320_v28, %v81_v9  ;;  %v122_v30 = vadd.f32 %v365_v2, %v113_v25   ;;  %v123_v31 = vadd.f32 %v361_v1, %v114_v26   ;;  %v495_v4 = vmov %v119_v27 }
  0x15   :  { %v148_v48 = vrot.slane (%p67_p0), %v119_v27, 4  ;;  %v127_v4 = vadd.f32 (%p67_p0), %v126_v60, %v125_v52 }
  0x16   : > { %v95_v32 = vmax.f32 %v93_v29, %v94_v24  ;;  %321 = vlog2.f32 %v93_v29  ;;  %v492_v1 = vmov %v123_v31  ;;  %v493_v2 = vmov %v122_v30 }
  0x17   :  { %v160_v50 = vrot.slane (%p67_p0), %v122_v30, 4  ;;  %v166_v51 = vrot.slane (%p67_p0), %v123_v31, 4  ;;  %v149_v56 = vadd.f32 (%p67_p0), %v148_v48, %v119_v27  ;;  %v128_v12 = vrot.slane (%p67_p0), %v127_v4, 1 }
  0x18   : > { %vm96_vm1 = vcmp.lt.f32.partialorder %v95_v32, 1.25  ;;  %vm99_vm2 = vcmp.lt.f32.partialorder %v95_v32, 1.5625  ;;  %vm102_vm3 = vcmp.lt.f32.partialorder %v95_v32, 1.953125 }
  0x19   : > { %v240_v33 = vsel %vm96_vm1, 1.0, %v396_v13  ;;  %v241_v34 = vsel %vm99_vm2, 1.0, %v396_v13  ;;  %v242_v35 = vsel %vm102_vm3, 1.0, %v396_v13  ;;  %v161_v58 = vadd.f32 (%p67_p0), %v160_v50, %v122_v30 }
  0x1a   : > { %v116_v36 = vadd.f32 %v385_v7, %v240_v33   ;;  %v117_v37 = vadd.f32 %v381_v6, %v241_v34   ;;  %v118_v38 = vadd.f32 %v377_v5, %v242_v35   ;;  %v167_v59 = vadd.f32 (%p67_p0), %v166_v51, %v123_v31  ;;  %v186_v33 = vld [vmem:[%s491_s3] sm:$0xff] (%p67_p0) }
  0x1b   :  { %v150_v0 = vrot.slane (%p67_p0), %v149_v56, 2  ;;  %v162_v2 = vrot.slane (%p67_p0), %v161_v58, 2  ;;  %v129_v18 = vadd.f32 (%p67_p0), %v128_v12, %v127_v4 }
  0x1c   : > { %v322_v39 = vpop.eup %321  ;;  %v496_v5 = vmov %v118_v38  ;;  %v497_v6 = vmov %v117_v37  ;;  %v498_v7 = vmov %v116_v36  ;;  %v130_v45 = vrot.slane (%p67_p0), %v116_v36, 4 }
  0x1d   : > { %v109_v40 = vmul.f32 0.6931472, %v322_v39  ;;  %v136_v46 = vrot.slane (%p67_p0), %v117_v37, 4  ;;  %v142_v47 = vrot.slane (%p67_p0), %v118_v38, 4  ;;  %v151_v8 = vadd.f32 (%p67_p0), %v150_v0, %v149_v56 }
  0x1e   :  { %v131_v53 = vadd.f32 (%p67_p0), %v130_v45, %v116_v36  ;;  %v163_v10 = vadd.f32 (%p67_p0), %v162_v2, %v161_v58 }
  0x1f   : > { %v110_v41 = vsel %vm88_vm0, %v109_v40, 0.0  ;;  %v137_v54 = vadd.f32 (%p67_p0), %v136_v46, %v117_v37  ;;  %v143_v55 = vadd.f32 (%p67_p0), %v142_v47, %v118_v38  ;;  %v152_v16 = vrot.slane (%p67_p0), %v151_v8, 1 }
  0x20   : > { %v120_v42 = vmul.f32 %v110_v41, %v110_v41  ;;  %69 = sbr.rel (!%p67_p0) target bundleno = 3 (0x3), region = 51  ;;  %v132_v61 = vrot.slane (%p67_p0), %v131_v53, 2  ;;  %v164_v21 = vrot.slane (%p67_p0), %v163_v10, 1 }
  0x21   :  { %v138_v62 = vrot.slane (%p67_p0), %v137_v54, 2  ;;  %v144_v63 = vrot.slane (%p67_p0), %v143_v55, 2  ;;  %v153_v24 = vadd.f32 (%p67_p0), %v152_v16, %v151_v8 }
  0x22   : > { %v121_v43 = vadd.f32 %v369_v3, %v120_v42   ;;  %v133_v5 = vadd.f32 (%p67_p0), %v132_v61, %v131_v53  ;;  %v165_v27 = vadd.f32 (%p67_p0), %v164_v21, %v163_v10 }
  0x23   :  { %v139_v6 = vadd.f32 (%p67_p0), %v138_v62, %v137_v54  ;;  %v145_v7 = vadd.f32 (%p67_p0), %v144_v63, %v143_v55 }
  0x24   : > { %v494_v3 = vmov %v121_v43  ;;  %v154_v49 = vrot.slane (%p67_p0), %v121_v43, 4  ;;  %v134_v13 = vrot.slane (%p67_p0), %v133_v5, 1 }
  0x25   :  { %v168_v3 = vrot.slane %v167_v59, 2  ;;  %v140_v14 = vrot.slane %v139_v6, 1  ;;  %v146_v15 = vrot.slane %v145_v7, 1 }
  0x26   :  { %v155_v57 = vadd.f32 %v154_v49, %v121_v43  ;;  %v135_v19 = vadd.f32 %v134_v13, %v133_v5 }
  0x27   :  { %v169_v11 = vadd.f32 %v168_v3, %v167_v59  ;;  %v141_v20 = vadd.f32 %v140_v14, %v139_v6  ;;  %v147_v22 = vadd.f32 %v146_v15, %v145_v7 }
  0x28   :  { %v156_v1 = vrot.slane %v155_v57, 2  ;;  %v173_v26 = vsel %vm172_vm4, %v129_v18, %v135_v19 }
  0x29   :  { %v170_v23 = vrot.slane %v169_v11, 1  ;;  %v175_v28 = vsel %vm174_vm5, %v173_v26, %v141_v20 }
  0x2a   :  { %v157_v9 = vadd.f32 %v156_v1, %v155_v57  ;;  %v177_v30 = vsel %vm176_vm6, %v175_v28, %v147_v22 }
  0x2b   :  { %v171_v29 = vadd.f32 %v170_v23, %v169_v11  ;;  %v179_v31 = vsel %vm178_vm7, %v177_v30, %v153_v24 }
  0x2c   :  { %v158_v17 = vrot.slane %v157_v9, 1 }
  0x2e   :  { %v159_v25 = vadd.f32 %v158_v17, %v157_v9 }
  0x30   :  { %v181_v32 = vsel %vm180_vm8, %v179_v31, %v159_v25 }
  0x31   :  { %v183_v34 = vsel %vm182_vm9, %v181_v32, %v165_v27 }
  0x32   :  { %v185_v35 = vsel %vm184_vm10, %v183_v34, %v171_v29 }
  0x33   :  { %v187_v36 = vadd.f32 %v186_v33, %v185_v35 }
  0x35   :  { %188 = vst [vmem:[%s491_s3] sm:$0xff] %v187_v36 }

</bundles_post_ra>
